<compile_context>
chip_gen: v5e
topology: v5e:2x2
jax: 0.10.0
libtpu: 0.0.40
codegen_flags: <defaults>
</compile_context>

<pallas_src>
import functools

import jax
import jax.numpy as jnp
from jax.experimental import pallas as pl
from jax.experimental.pallas import tpu as pltpu


def _arm_kernel(x_ref, wk_ref, b1_ref, wa_ref, b2_ref, rep_ref, o_ref, xpad_ref,
                *, H, W, Cin, Cout):
    """One batch element per grid step.  All tensors use the (row, W*C) layout.

    x_ref   : (1, H, W*Cin)          input tile (channels packed into lanes)
    wk_ref  : (3, W*Cin, W*Cout)     per-ky block-Toeplitz conv weights (BN1 scale folded)
    b1_ref  : (1, W*Cout)            folded BN1 bias, tiled over W
    wa_ref  : (W*Cout, Cout)         1x1 atten weights tiled over W, /(H*W), BN2 scale folded
    b2_ref  : (1, Cout)              folded BN2 bias
    rep_ref : (Cout, W*Cout)         channel -> lane replication matrix
    o_ref   : (1, H, W*Cout)         output tile (lane-dense, W*Cout = 128 here)
    xpad_ref: (H+2, W*Cin)           VMEM scratch holding the vertically padded image
    """
    WCi = W * Cin
    WCo = W * Cout

    # --- in-kernel halo: only vertical zero padding is needed (horizontal
    #     padding is already folded into the block-Toeplitz weights).
    xpad_ref[0:1, :] = jnp.zeros((1, WCi), jnp.float32)
    xpad_ref[H + 1:H + 2, :] = jnp.zeros((1, WCi), jnp.float32)
    xpad_ref[1:H + 1, :] = x_ref[0].astype(jnp.float32)

    # --- 3x3 conv (stride 1, pad 1) as 3 lane-dense matmuls, accumulated in f32.
    #     K = W*Cin, N = W*Cout (vs. 9 matmuls with K = Cin before).
    acc = jnp.zeros((H, WCo), jnp.float32)
    for ky in range(3):
        acc = acc + jnp.dot(xpad_ref[ky:ky + H, :], wk_ref[ky],
                            preferred_element_type=jnp.float32)

    # --- BN1 (scale folded into wk) bias + ReLU
    feat = jnp.maximum(acc + b1_ref[...], 0.0)                       # (H, W*Cout)

    # --- global average pool on the MXU: ones-row matmul sums over rows,
    #     the fold over W and the 1/(H*W) factor are baked into wa_ref.
    col_sum = jnp.dot(jnp.ones((1, H), jnp.float32), feat,
                      preferred_element_type=jnp.float32)            # (1, W*Cout)

    # --- 1x1 conv + BN2 + sigmoid (EUP)
    atten = jnp.dot(col_sum, wa_ref[...],
                    preferred_element_type=jnp.float32)              # (1, Cout)
    atten = jax.nn.sigmoid(atten + b2_ref[...])                      # (1, Cout)

    # --- replicate the per-channel attention across the W-packed lanes (MXU)
    atten_flat = jnp.dot(atten, rep_ref[...],
                         preferred_element_type=jnp.float32)         # (1, W*Cout)

    # --- broadcast multiply, lane-dense store
    o_ref[...] = (feat * atten_flat).reshape(1, H, WCo).astype(o_ref.dtype)


def fold_arm_params(w_conv_hwio, bn1_scale, bn1_bias, w_atten,
                    bn2_scale, bn2_bias, H, W):
    """One-time parameter folding (would run at model-load time in production).

    w_conv_hwio : (3, 3, Cin, Cout)   3x3 conv weights (HWIO)
    bn*_scale/bias : (Cout,)          inference-mode BN folded to scale/bias
    w_atten     : (Cout, Cout)        1x1 attention conv weights, (cin, cout)
    """
    KH, KW, Cin, Cout = w_conv_hwio.shape
    f32 = jnp.float32

    # block-Toeplitz selection: sel[kx, xi, xo] = 1 iff xi == xo + kx - 1 (pad=1);
    # out-of-range horizontal taps simply have no row -> implicit zero padding.
    xi = jnp.arange(W)
    xo = jnp.arange(W)
    kx = jnp.arange(KW)
    sel = (xi[None, :, None] == (xo[None, None, :] + kx[:, None, None] - 1)).astype(f32)

    # wk[ky, xi, ci, xo, co] = w[ky, xi - xo + 1, ci, co] (when the tap exists)
    wk = jnp.einsum('yxio,xab->yaibo', w_conv_hwio.astype(f32), sel)
    wk = wk.reshape(KH, W * Cin, W * Cout)

    s1_flat = jnp.tile(bn1_scale.reshape(1, Cout).astype(f32), (1, W))   # (1, W*Cout)
    wk = wk * s1_flat.reshape(1, 1, W * Cout)                            # fold BN1 scale
    b1_flat = jnp.tile(bn1_bias.reshape(1, Cout).astype(f32), (1, W))    # (1, W*Cout)

    # 1x1 conv weights tiled over the W-packed lanes, with 1/(H*W) mean factor
    # and the BN2 scale folded in.
    wa_fold = jnp.tile(w_atten.astype(f32), (W, 1)) / float(H * W)       # (W*Cout, Cout)
    wa_fold = wa_fold * bn2_scale.reshape(1, Cout).astype(f32)
    b2 = bn2_bias.reshape(1, Cout).astype(f32)

    # replication matrix: atten (1, Cout) @ rep -> (1, W*Cout) lane broadcast
    rep = jnp.tile(jnp.eye(Cout, dtype=f32), (1, W))                     # (Cout, W*Cout)

    return wk, b1_flat, wa_fold, b2, rep


def attention_refinement_pallas(x_nhwc, folded):
    wk, b1_flat, wa_fold, b2, rep = folded
    N, H, W, Cin = x_nhwc.shape
    Cout = wa_fold.shape[1]
    assert wa_fold.shape[0] == W * Cout

    # free reshape: pack channels into the lane axis together with W
    x_flat = x_nhwc.reshape(N, H, W * Cin)

    kernel = functools.partial(_arm_kernel, H=H, W=W, Cin=Cin, Cout=Cout)

    out_flat = pl.pallas_call(
        kernel,
        out_shape=jax.ShapeDtypeStruct((N, H, W * Cout), x_nhwc.dtype),
        grid=(N,),
        in_specs=[
            pl.BlockSpec((1, H, W * Cin), lambda b: (b, 0, 0)),
            pl.BlockSpec((3, W * Cin, W * Cout), lambda b: (0, 0, 0)),
            pl.BlockSpec((1, W * Cout), lambda b: (0, 0)),
            pl.BlockSpec((W * Cout, Cout), lambda b: (0, 0)),
            pl.BlockSpec((1, Cout), lambda b: (0, 0)),
            pl.BlockSpec((Cout, W * Cout), lambda b: (0, 0)),
        ],
        out_specs=pl.BlockSpec((1, H, W * Cout), lambda b: (b, 0, 0)),
        scratch_shapes=[pltpu.VMEM((H + 2, W * Cin), jnp.float32)],
        compiler_params=pltpu.CompilerParams(
            dimension_semantics=("parallel",)),
    )(x_flat, wk, b1_flat, wa_fold, b2, rep)

    # free un-reshape back to NHWC
    return out_flat.reshape(N, H, W, Cout)


def reference_jax(x_nhwc, w_conv_hwio, bn1_scale, bn1_bias, w_atten,
                  bn2_scale, bn2_bias):
    """Pure-JAX reference of the same forward pass (for correctness check)."""
    conv = jax.lax.conv_general_dilated(
        x_nhwc, w_conv_hwio, window_strides=(1, 1), padding="SAME",
        dimension_numbers=("NHWC", "HWIO", "NHWC"))
    feat = jnp.maximum(conv * bn1_scale + bn1_bias, 0.0)
    atten = jnp.mean(feat, axis=(1, 2))                      # (N, Cout)
    atten = atten @ w_atten
    atten = jax.nn.sigmoid(atten * bn2_scale + bn2_bias)
    return feat * atten[:, None, None, :]


if __name__ == "__main__":
    # Small shapes consistent with the module: NCHW input (2, 4, 16, 16).
    N, Cin, H, W = 2, 4, 16, 16
    Cout = 8

    key = jax.random.PRNGKey(0)
    k_x, k_wc, k_wa, k_g1, k_b1, k_g2, k_b2 = jax.random.split(key, 7)

    # Input in PyTorch's NCHW, converted to NHWC for the kernel.
    x_nchw = jax.random.normal(k_x, (N, Cin, H, W), jnp.float32)
    x_nhwc = jnp.transpose(x_nchw, (0, 2, 3, 1))

    # conv3x3 weights: PyTorch layout (Cout, Cin, 3, 3), kaiming_normal_(a=1)
    # -> std = sqrt(2 / (1 + 1^2) / fan_in) = sqrt(1 / (Cin*9))
    w_conv_oihw = jax.random.normal(k_wc, (Cout, Cin, 3, 3), jnp.float32) \
        * (1.0 / (Cin * 9)) ** 0.5
    w_conv_hwio = jnp.transpose(w_conv_oihw, (2, 3, 1, 0))          # (3,3,Cin,Cout)

    # conv1x1 attention weights: PyTorch (Cout, Cin=Cout, 1, 1) -> (Cin, Cout)
    w_atten_oihw = jax.random.normal(k_wa, (Cout, Cout, 1, 1), jnp.float32) \
        * (1.0 / Cout) ** 0.5
    w_atten = jnp.transpose(w_atten_oihw[:, :, 0, 0], (1, 0))

    # BatchNorm (inference mode) folded into per-channel scale/bias.
    eps = 1e-5
    gamma1 = 1.0 + 0.1 * jax.random.normal(k_g1, (Cout,), jnp.float32)
    beta1 = 0.1 * jax.random.normal(k_b1, (Cout,), jnp.float32)
    mean1 = jnp.zeros((Cout,), jnp.float32)
    var1 = jnp.ones((Cout,), jnp.float32)
    bn1_scale = gamma1 / jnp.sqrt(var1 + eps)
    bn1_bias = beta1 - mean1 * bn1_scale

    gamma2 = 1.0 + 0.1 * jax.random.normal(k_g2, (Cout,), jnp.float32)
    beta2 = 0.1 * jax.random.normal(k_b2, (Cout,), jnp.float32)
    mean2 = jnp.zeros((Cout,), jnp.float32)
    var2 = jnp.ones((Cout,), jnp.float32)
    bn2_scale = gamma2 / jnp.sqrt(var2 + eps)
    bn2_bias = beta2 - mean2 * bn2_scale

    folded = fold_arm_params(w_conv_hwio, bn1_scale, bn1_bias, w_atten,
                             bn2_scale, bn2_bias, H, W)

    out = attention_refinement_pallas(x_nhwc, folded)
    out = jax.block_until_ready(out)

    ref = reference_jax(x_nhwc, w_conv_hwio, bn1_scale, bn1_bias, w_atten,
                        bn2_scale, bn2_bias)
    ref = jax.block_until_ready(ref)

    assert out.shape == (N, H, W, Cout)
    max_err = jnp.max(jnp.abs(out - ref))
    assert jnp.allclose(out, ref, atol=1e-3, rtol=1e-3), \
        f"max abs err = {max_err}"

    print("KERNEL_OK")
</pallas_src>

<mosaic_0001>
module attributes {stable_mosaic.version = 11 : i64} {
  func.func @_arm_kernel(%arg0: i32, %arg1: memref<1x16x64xf32, #tpu.memory_space<vmem>>, %arg2: memref<3x64x128xf32, #tpu.memory_space<vmem>>, %arg3: memref<1x128xf32, #tpu.memory_space<vmem>>, %arg4: memref<128x8xf32, #tpu.memory_space<vmem>>, %arg5: memref<1x8xf32, #tpu.memory_space<vmem>>, %arg6: memref<8x128xf32, #tpu.memory_space<vmem>>, %arg7: memref<1x16x128xf32, #tpu.memory_space<vmem>>, %arg8: memref<18x64xf32, #tpu.memory_space<vmem>>) attributes {dimension_semantics = [#tpu.dimension_semantics<parallel>], iteration_bounds = array<i64: 2>, scalar_prefetch = 0 : i64, scratch_operands = 1 : i64, tpu.core_type = #tpu.core_type<tc>, window_params = [{transform_indices = @transform_0, window_bounds = array<i64: 1, 16, 64>}, {pipeline_mode = #tpu.pipeline_mode<synchronous>, transform_indices = @transform_1, window_bounds = array<i64: 3, 64, 128>}, {pipeline_mode = #tpu.pipeline_mode<synchronous>, transform_indices = @transform_2, window_bounds = array<i64: 1, 128>}, {pipeline_mode = #tpu.pipeline_mode<synchronous>, transform_indices = @transform_3, window_bounds = array<i64: 128, 8>}, {pipeline_mode = #tpu.pipeline_mode<synchronous>, transform_indices = @transform_4, window_bounds = array<i64: 1, 8>}, {pipeline_mode = #tpu.pipeline_mode<synchronous>, transform_indices = @transform_5, window_bounds = array<i64: 8, 128>}, {transform_indices = @transform_6, window_bounds = array<i64: 1, 16, 128>}]} {
    %cst = arith.constant 0.000000e+00 : f32
    %0 = vector.broadcast %cst : f32 to vector<1x64xf32>
    %c0 = arith.constant 0 : index
    %c0_0 = arith.constant 0 : index
    %1 = vector.load %arg8[%c0, %c0_0] : memref<18x64xf32, #tpu.memory_space<vmem>>, vector<1x64xf32>
    tpu.vector_store %arg8[%c0, %c0_0], %0 {strides = array<i32>} : memref<18x64xf32, #tpu.memory_space<vmem>>, vector<1x64xf32>,
    %cst_1 = arith.constant 0.000000e+00 : f32
    %2 = vector.broadcast %cst_1 : f32 to vector<1x64xf32>
    %c17 = arith.constant 17 : index
    %c0_2 = arith.constant 0 : index
    %3 = vector.load %arg8[%c17, %c0_2] : memref<18x64xf32, #tpu.memory_space<vmem>>, vector<1x64xf32>
    tpu.vector_store %arg8[%c17, %c0_2], %2 {strides = array<i32>} : memref<18x64xf32, #tpu.memory_space<vmem>>, vector<1x64xf32>,
    %c0_3 = arith.constant 0 : index
    %c0_4 = arith.constant 0 : index
    %c0_5 = arith.constant 0 : index
    %4 = vector.load %arg1[%c0_3, %c0_4, %c0_5] : memref<1x16x64xf32, #tpu.memory_space<vmem>>, vector<1x16x64xf32>
    %5 = vector.shape_cast %4 : vector<1x16x64xf32> to vector<16x64xf32>
    %c1 = arith.constant 1 : index
    %c0_6 = arith.constant 0 : index
    %6 = vector.load %arg8[%c1, %c0_6] : memref<18x64xf32, #tpu.memory_space<vmem>>, vector<16x64xf32>
    tpu.vector_store %arg8[%c1, %c0_6], %5 {strides = array<i32>} : memref<18x64xf32, #tpu.memory_space<vmem>>, vector<16x64xf32>,
    %cst_7 = arith.constant 0.000000e+00 : f32
    %7 = vector.broadcast %cst_7 : f32 to vector<16x128xf32>
    %c0_8 = arith.constant 0 : index
    %c0_9 = arith.constant 0 : index
    %8 = vector.load %arg8[%c0_8, %c0_9] : memref<18x64xf32, #tpu.memory_space<vmem>>, vector<16x64xf32>
    %c0_10 = arith.constant 0 : index
    %c0_11 = arith.constant 0 : index
    %c0_12 = arith.constant 0 : index
    %9 = vector.load %arg2[%c0_10, %c0_11, %c0_12] : memref<3x64x128xf32, #tpu.memory_space<vmem>>, vector<1x64x128xf32>
    %10 = vector.shape_cast %9 : vector<1x64x128xf32> to vector<64x128xf32>
    %cst_13 = arith.constant dense<0.000000e+00> : vector<16x128xf32>
    %11 = tpu.matmul %8, %10, %cst_13 {dimension_numbers = #tpu.dot_dimension_numbers<[1], [0], [0], [1], [0, 0, 1, 1], [], []>} : vector<16x64xf32>, vector<64x128xf32>, vector<16x128xf32> -> vector<16x128xf32>
    %12 = arith.addf %7, %11 : vector<16x128xf32>
    %c1_14 = arith.constant 1 : index
    %c0_15 = arith.constant 0 : index
    %13 = vector.load %arg8[%c1_14, %c0_15] : memref<18x64xf32, #tpu.memory_space<vmem>>, vector<16x64xf32>
    %c1_16 = arith.constant 1 : index
    %c0_17 = arith.constant 0 : index
    %c0_18 = arith.constant 0 : index
    %14 = vector.load %arg2[%c1_16, %c0_17, %c0_18] : memref<3x64x128xf32, #tpu.memory_space<vmem>>, vector<1x64x128xf32>
    %15 = vector.shape_cast %14 : vector<1x64x128xf32> to vector<64x128xf32>
    %cst_19 = arith.constant dense<0.000000e+00> : vector<16x128xf32>
    %16 = tpu.matmul %13, %15, %cst_19 {dimension_numbers = #tpu.dot_dimension_numbers<[1], [0], [0], [1], [0, 0, 1, 1], [], []>} : vector<16x64xf32>, vector<64x128xf32>, vector<16x128xf32> -> vector<16x128xf32>
    %17 = arith.addf %12, %16 : vector<16x128xf32>
    %c2 = arith.constant 2 : index
    %c0_20 = arith.constant 0 : index
    %18 = vector.load %arg8[%c2, %c0_20] : memref<18x64xf32, #tpu.memory_space<vmem>>, vector<16x64xf32>
    %c2_21 = arith.constant 2 : index
    %c0_22 = arith.constant 0 : index
    %c0_23 = arith.constant 0 : index
    %19 = vector.load %arg2[%c2_21, %c0_22, %c0_23] : memref<3x64x128xf32, #tpu.memory_space<vmem>>, vector<1x64x128xf32>
    %20 = vector.shape_cast %19 : vector<1x64x128xf32> to vector<64x128xf32>
    %cst_24 = arith.constant dense<0.000000e+00> : vector<16x128xf32>
    %21 = tpu.matmul %18, %20, %cst_24 {dimension_numbers = #tpu.dot_dimension_numbers<[1], [0], [0], [1], [0, 0, 1, 1], [], []>} : vector<16x64xf32>, vector<64x128xf32>, vector<16x128xf32> -> vector<16x128xf32>
    %22 = arith.addf %17, %21 : vector<16x128xf32>
    %c0_25 = arith.constant 0 : index
    %c0_26 = arith.constant 0 : index
    %23 = vector.load %arg3[%c0_25, %c0_26] : memref<1x128xf32, #tpu.memory_space<vmem>>, vector<1x128xf32>
    %24 = vector.broadcast %23 : vector<1x128xf32> to vector<16x128xf32>
    %25 = arith.addf %22, %24 : vector<16x128xf32>
    %cst_27 = arith.constant 0.000000e+00 : f32
    %26 = vector.broadcast %cst_27 : f32 to vector<16x128xf32>
    %27 = arith.maximumf %25, %26 : vector<16x128xf32>
    %cst_28 = arith.constant 1.000000e+00 : f32
    %28 = vector.broadcast %cst_28 : f32 to vector<1x16xf32>
    %cst_29 = arith.constant dense<0.000000e+00> : vector<1x128xf32>
    %29 = tpu.matmul %28, %27, %cst_29 {dimension_numbers = #tpu.dot_dimension_numbers<[1], [0], [0], [1], [0, 0, 1, 1], [], []>} : vector<1x16xf32>, vector<16x128xf32>, vector<1x128xf32> -> vector<1x128xf32>
    %c0_30 = arith.constant 0 : index
    %c0_31 = arith.constant 0 : index
    %30 = vector.load %arg4[%c0_30, %c0_31] : memref<128x8xf32, #tpu.memory_space<vmem>>, vector<128x8xf32>
    %cst_32 = arith.constant dense<0.000000e+00> : vector<1x8xf32>
    %31 = tpu.matmul %29, %30, %cst_32 {dimension_numbers = #tpu.dot_dimension_numbers<[1], [0], [0], [1], [0, 0, 1, 1], [], []>} : vector<1x128xf32>, vector<128x8xf32>, vector<1x8xf32> -> vector<1x8xf32>
    %c0_33 = arith.constant 0 : index
    %c0_34 = arith.constant 0 : index
    %32 = vector.load %arg5[%c0_33, %c0_34] : memref<1x8xf32, #tpu.memory_space<vmem>>, vector<1x8xf32>
    %33 = arith.addf %31, %32 : vector<1x8xf32>
    %34 = arith.negf %33 : vector<1x8xf32>
    %35 = math.exp %34 : vector<1x8xf32>
    %cst_35 = arith.constant 1.000000e+00 : f32
    %36 = vector.broadcast %cst_35 : f32 to vector<1x8xf32>
    %37 = arith.addf %36, %35 : vector<1x8xf32>
    %38 = arith.divf %36, %37 : vector<1x8xf32>
    %c0_36 = arith.constant 0 : index
    %c0_37 = arith.constant 0 : index
    %39 = vector.load %arg6[%c0_36, %c0_37] : memref<8x128xf32, #tpu.memory_space<vmem>>, vector<8x128xf32>
    %cst_38 = arith.constant dense<0.000000e+00> : vector<1x128xf32>
    %40 = tpu.matmul %38, %39, %cst_38 {dimension_numbers = #tpu.dot_dimension_numbers<[1], [0], [0], [1], [0, 0, 1, 1], [], []>} : vector<1x8xf32>, vector<8x128xf32>, vector<1x128xf32> -> vector<1x128xf32>
    %41 = vector.broadcast %40 : vector<1x128xf32> to vector<16x128xf32>
    %42 = arith.mulf %27, %41 : vector<16x128xf32>
    %43 = vector.shape_cast %42 : vector<16x128xf32> to vector<1x16x128xf32>
    %c0_39 = arith.constant 0 : index
    %c0_40 = arith.constant 0 : index
    %c0_41 = arith.constant 0 : index
    %44 = vector.load %arg7[%c0_39, %c0_40, %c0_41] : memref<1x16x128xf32, #tpu.memory_space<vmem>>, vector<1x16x128xf32>
    tpu.vector_store %arg7[%c0_39, %c0_40, %c0_41], %43 {strides = array<i32>} : memref<1x16x128xf32, #tpu.memory_space<vmem>>, vector<1x16x128xf32>,
    return
  }
  func.func @transform_0(%arg0: i32) -> (i32, i32, i32) {
    %c0_i32 = arith.constant 0 : i32
    %c0_i32_0 = arith.constant 0 : i32
    %c0_i32_1 = arith.constant 0 : i32
    return %arg0, %c0_i32, %c0_i32_0 : i32, i32, i32
  }
  func.func @transform_1(%arg0: i32) -> (i32, i32, i32) {
    %c0_i32 = arith.constant 0 : i32
    %c0_i32_0 = arith.constant 0 : i32
    %c0_i32_1 = arith.constant 0 : i32
    %c0_i32_2 = arith.constant 0 : i32
    return %c0_i32, %c0_i32_0, %c0_i32_1 : i32, i32, i32
  }
  func.func @transform_2(%arg0: i32) -> (i32, i32) {
    %c0_i32 = arith.constant 0 : i32
    %c0_i32_0 = arith.constant 0 : i32
    %c0_i32_1 = arith.constant 0 : i32
    return %c0_i32, %c0_i32_0 : i32, i32
  }
  func.func @transform_3(%arg0: i32) -> (i32, i32) {
    %c0_i32 = arith.constant 0 : i32
    %c0_i32_0 = arith.constant 0 : i32
    %c0_i32_1 = arith.constant 0 : i32
    return %c0_i32, %c0_i32_0 : i32, i32
  }
  func.func @transform_4(%arg0: i32) -> (i32, i32) {
    %c0_i32 = arith.constant 0 : i32
    %c0_i32_0 = arith.constant 0 : i32
    %c0_i32_1 = arith.constant 0 : i32
    return %c0_i32, %c0_i32_0 : i32, i32
  }
  func.func @transform_5(%arg0: i32) -> (i32, i32) {
    %c0_i32 = arith.constant 0 : i32
    %c0_i32_0 = arith.constant 0 : i32
    %c0_i32_1 = arith.constant 0 : i32
    return %c0_i32, %c0_i32_0 : i32, i32
  }
  func.func @transform_6(%arg0: i32) -> (i32, i32, i32) {
    %c0_i32 = arith.constant 0 : i32
    %c0_i32_0 = arith.constant 0 : i32
    %c0_i32_1 = arith.constant 0 : i32
    return %arg0, %c0_i32, %c0_i32_0 : i32, i32, i32
  }
}

</mosaic_0001>

<bundles_post_ra>
// kernel: tpu_custom_call.1
= control target key start
LH: loop header
LB: loop body
LE: loop exit
PB: predicated region body
PF: predicated region fallthrough
CT: control target
= control target key end

     0   :  { %11 = vsyncpa [#allocation4], 0  ;;  %s990_s0 = inlined_call_operand.vmem [shape: f32[2,16,64], index: 0, kind: input, shape index: {}]   ;;  %s991_s1 = inlined_call_operand.hbm [shape: f32[3,64,128], index: 1, kind: input, shape index: {}]   ;;  %s992_s2 = inlined_call_operand.vmem [shape: f32[1,128], index: 2, kind: input, shape index: {}]   ;;  %s993_s3 = inlined_call_operand.vmem [shape: f32[128,8], index: 3, kind: input, shape index: {}]   ;;  %s994_s4 = inlined_call_operand.vmem [shape: f32[1,8], index: 4, kind: input, shape index: {}]   ;;  %s995_s5 = inlined_call_operand.vmem [shape: f32[8,128], index: 5, kind: input, shape index: {}]   ;;  %s996_s6 = inlined_call_operand.hbm [shape: f32[2,16,128], index: 6, kind: output, shape index: {}]  }
   0x1   :  { %12 = vsyncpa [#allocation5], 0 }
   0x2   :  { %14 = vsyncpa [#allocation5 + $0x1], 0  ;;  %s830_s21 = smov 0   ;;  %s832_s22 = smov 0  }
   0x3   :  { %s834_s23 = smov 0   ;;  %s836_s24 = smov 0  }
   0x4 LB: > { %s851_s25 = sadd.s32 4294967295, %s786_s24   ;;  %s604_s26 = sadd.s32 4294967294, %s786_s24   ;;  %s786_s24 = sphi %s836_s24, %s1002_s24   ;;  %s782_s23 = sphi %s834_s23, %s1001_s23   ;;  %s778_s22 = sphi %s832_s22, %s1000_s22   ;;  %s774_s21 = sphi %s830_s21, %s999_s21  }
   0x5   : > { %s855_s27 = sadd.s32 1, %s786_s24   ;;  %s158_s28 = sadd.s32 1, %s782_s23 }
   0x6   : > { %s155_s29 = ssub.s32 %s786_s24, %s855_s27  ;;  %p168_p0 = scmp.ne.s32.totalorder %s782_s23, %s778_s22 }
   0x7   : > { %p156_p1 = scmp.eq.s32.totalorder %s155_s29, 0  ;;  %p169_p2 = scmp.eq.s32.totalorder %s851_s25, 1 }
   0x8   : > { %p174_p3 = scmp.ne.s32.totalorder %s778_s22, %s774_s21  ;;  %p175_p4 = scmp.eq.s32.totalorder %s604_s26, 1 }
   0x9   : > { %s866_s30 = scalar_select %p156_p1, %s782_s23, %s158_s28  }
   0xa   : > { %p868_p5 = por %p169_p2, %p168_p0  ;;  %p872_p6 = por %p175_p4, %p174_p3 }
   0xb   : > { %p605_p7 = scmp.ge.s32.totalorder %s786_s24, 1  ;;  %p182_p8 = scmp.lt.s32.totalorder %s786_s24, 3 }
   0xc   : > { %p643_p9 = scmp.eq.s32.totalorder %s851_s25, 0  ;;  %s193_s11 = sshll.u32 %s991_s1, 4  ;;  %s194_s11 = int_to_ptr.hbm [resolvable:$true] %s193_s11 }
   0xd   : > { %p183_p10 = pnand %p605_p7, %p182_p8  ;;  %s788_s12 = smov [#allocation3]  }
   0xe   : > { %s195_s13 = sshll.u32 %s788_s12, 4  ;;  %s789_s14 = smov 128   ;;  %s196_s13 = int_to_ptr.vmem [resolvable:$true] %s195_s13 }
   0xf   : > { %p635_p11 = pneg %p183_p10  ;;  %s790_s15 = smov 8  }
  0x10   : > { %231 = sbr.rel (%p183_p10) target bundleno = 611 (0x263), region = 44 }
  0x11   : > { %p636_p12 = pnand %p643_p9, %p635_p11 }
  0x13   : > { %638 = dma.hbm_to_vmem [thread:$0]  (!%p636_p12), %s194_s11, 3072, %s196_s13, [#allocation4], %s789_s14, %s789_s14, %s790_s15  }
  0x15   : > { %765 = dma.done.wait (%p643_p9), [#allocation4], 3072  }
  0x16   : > { %767 = vsyncadd (%p643_p9), [#allocation4], 4294964224  ;;  %p262_p13 = scmp.lt.s32.totalorder %s851_s25, 1  ;;  %vm267_vm0 = vcmask 516096   ;;  %v791_v0 = vmov 0.0   ;;  %v364_v1 = vld [vmem:[#allocation3 + $0xb8] sm:$0xff] }
  0x17   : > { %268 = vst.msk [vmem:[#allocation2] sm:$0x1] %vm267_vm0, %v791_v0  ;;  %v363_v2 = vld [vmem:[#allocation3 + $0xb0] sm:$0xff]  ;;  %v295_v3 = vld [vmem:[#allocation3 + $0x78] sm:$0xff]  ;;  %379 = vmatpush.msra.mxu2 %v364_v1  ;;  %v362_v6 = vld [vmem:[#allocation3 + $0xa8] sm:$0xff]  ;;  %vm272_vm1 = vcmask 523264  }
  0x18   : > { %269 = vst.msk [vmem:[#allocation2 + $0x11] sm:$0x1] %vm267_vm0, %v791_v0  ;;  %s263_s16 = scalar_select %p262_p13, %s851_s25, 1  ;;  %310 = vmatpush.msra.mxu0 %v295_v3  ;;  %v284_v4 = vld [vmem:[#allocation3 + $0x38] sm:$0xff]  ;;  %v294_v5 = vld [vmem:[#allocation3 + $0x70] sm:$0xff]  ;;  %v293_v8 = vld [vmem:[#allocation3 + $0x68] sm:$0xff] }
  0x19   : > { %339 = vmatpush.msra.mxu1 %v284_v4  ;;  %v283_v7 = vld [vmem:[#allocation3 + $0x30] sm:$0xff]  ;;  %380 = vmatpush.msra.mxu2 %v363_v2  ;;  %v282_v9 = vld [vmem:[#allocation3 + $0x28] sm:$0xff]  ;;  %v361_v10 = vld [vmem:[#allocation3 + $0xa0] sm:$0xff]  ;;  %vm404_vm2 = vcmask 130048   ;;  %v792_v63 = vmov 1.0   ;;  %vm485_vm6 = vcmask 64512  }
  0x1a   : > { %s627_s17 = sshll.u32 %s263_s16, 4  ;;  %311 = vmatpush.msra.mxu0 %v294_v5  ;;  %v292_v11 = vld [vmem:[#allocation3 + $0x60] sm:$0xff]  ;;  %v360_v13 = vld [vmem:[#allocation3 + $0x98] sm:$0xff]  ;;  %v359_v18 = vld [vmem:[#allocation3 + $0x90] sm:$0xff]  ;;  %s259_s14 = sand.u32 1, %s778_s22  }
  0x1b   : > { %s266_s20 = scalar_lea.vmem %s990_s0, %s627_s17  ;;  %340 = vmatpush.msra.mxu1 %v283_v7  ;;  %381 = vmatpush.msra.mxu2 %v362_v6  ;;  %v281_v12 = vld [vmem:[#allocation3 + $0x20] sm:$0xff]  ;;  %v291_v14 = vld [vmem:[#allocation3 + $0x58] sm:$0xff]  ;;  %v290_v19 = vld [vmem:[#allocation3 + $0x50] sm:$0xff]  ;;  %s610_s15 = sshll.u32 %s259_s14, 4 }
  0x1c   : > { %312 = vmatpush.msra.mxu0 %v293_v8  ;;  %v270_v15 = vld [vmem:[%s266_s20] sm:$0xff]  ;;  %v280_v16 = vld [vmem:[#allocation3 + $0x18] sm:$0xff]  ;;  %v271_v17 = vld [vmem:[%s266_s20 + $0x8] sm:$0xff]  ;;  %s628_s16 = sshll.u32 %s851_s25, 4  ;;  %s261_s20 = scalar_lea.vmem [#allocation6], %s610_s15 }
  0x1d   : > { %341 = vmatpush.msra.mxu1 %v282_v9  ;;  %382 = vmatpush.msra.mxu2 %v361_v10  ;;  %273 = vst.msk [vmem:[#allocation2 + $0x1] sm:$0xff] %vm272_vm1, %v270_v15  ;;  %v279_v20 = vld [vmem:[#allocation3 + $0x10] sm:$0xff]  ;;  %v358_v21 = vld [vmem:[#allocation3 + $0x88] sm:$0xff]  ;;  %v357_v24 = vld [vmem:[#allocation3 + $0x80] sm:$0xff]  ;;  %s526_s19 = scalar_lea.hbm %s996_s6, %s628_s16  ;;  %s527_s26 = sshll.u32 %s261_s20, 4  ;;  %s528_s26 = int_to_ptr.vmem [resolvable:$true] %s527_s26 }
  0x1e   : > { %313 = vmatpush.msra.mxu0 %v292_v11  ;;  %274 = vst.msk [vmem:[#allocation2 + $0x9] sm:$0xff] %vm272_vm1, %v271_v17  ;;  %v289_v22 = vld [vmem:[#allocation3 + $0x48] sm:$0xff]  ;;  %v288_v25 = vld [vmem:[#allocation3 + $0x40] sm:$0xff]  ;;  %v442_v34 = vld [vmem:[%s993_s3 + $0x70] sm:$0xff]  ;;  %s529_s28 = sshll.u32 %s526_s19, 4  ;;  %s515_s29 = scalar_lea.sflag [#allocation5], %s259_s14  ;;  %s530_s28 = int_to_ptr.hbm [resolvable:$true] %s529_s28 }
  0x1f   : > { %342 = vmatpush.msra.mxu1 %v281_v12  ;;  %383 = vmatpush.msra.mxu2 %v360_v13  ;;  %v278_v23 = vld [vmem:[#allocation3 + $0x8] sm:$0xff]  ;;  %v277_v26 = vld [vmem:[#allocation3] sm:$0xff]  ;;  %v441_v35 = vld [vmem:[%s993_s3 + $0x68] sm:$0xff]  ;;  %s734_s9 = sshra.s32 %s530_s28, 4  ;;  %s740_s12 = scalar_lea.hbm %s996_s6, 32  ;;  %s735_s9 = int_to_ptr.hbm [resolvable:$true] %s734_s9 }
  0x20   : > { %314 = vmatpush.msra.mxu0 %v291_v14  ;;  %v443_v33 = vld [vmem:[%s993_s3 + $0x78] sm:$0xff]  ;;  %v440_v36 = vld [vmem:[%s993_s3 + $0x60] sm:$0xff]  ;;  %v438_v38 = vld [vmem:[%s993_s3 + $0x50] sm:$0xff]  ;;  %s736_s25 = scalar_lea.hbm %s735_s9, 16  ;;  %p741_p3 = scmp.lt.s32.totalorder %s735_s9, %s996_s6 }
  0x21   : > { %343 = vmatpush.msra.mxu1 %v280_v16  ;;  %384 = vmatpush.msra.mxu2 %v359_v18  ;;  %v439_v37 = vld [vmem:[%s993_s3 + $0x58] sm:$0xff]  ;;  %v437_v41 = vld [vmem:[%s993_s3 + $0x48] sm:$0xff]  ;;  %v436_v42 = vld [vmem:[%s993_s3 + $0x40] sm:$0xff]  ;;  %p737_p0 = scmp.ne.s32.totalorder %s735_s9, %s736_s25  ;;  %p742_p4 = scmp.lt.s32.totalorder %s740_s12, %s736_s25 }
  0x22   : > { %315 = vmatpush.msra.mxu0 %v290_v19  ;;  %445 = vmatpush.msra.mxu3 %v443_v33  ;;  %v435_v44 = vld [vmem:[%s993_s3 + $0x38] sm:$0xff]  ;;  %v434_v45 = vld [vmem:[%s993_s3 + $0x30] sm:$0xff]  ;;  %v433_v49 = vld [vmem:[%s993_s3 + $0x28] sm:$0xff] }
  0x23   : > { %344 = vmatpush.msra.mxu1 %v279_v20  ;;  %385 = vmatpush.msra.mxu2 %v358_v21  ;;  %v432_v51 = vld [vmem:[%s993_s3 + $0x20] sm:$0xff]  ;;  %v431_v55 = vld [vmem:[%s993_s3 + $0x18] sm:$0xff]  ;;  %v430_v57 = vld [vmem:[%s993_s3 + $0x10] sm:$0xff]  ;;  %p738_p1 = pnand %p737_p0, %p868_p5  ;;  %p743_p7 = por %p742_p4, %p741_p3 }
  0x24   : > { %316 = vmatpush.msra.mxu0 %v289_v22  ;;  %v285_v27 = vld [vmem:[#allocation2 + $0x1] sm:$0xff]  ;;  %446 = vmatpush.msra.mxu3 %v442_v34  ;;  %v685_v53 = vld [vmem:[%s992_s2] ss:$0 sm:$0xff] }
  0x25   : > { %345 = vmatpush.msra.mxu1 %v278_v23  ;;  %v275_v28 = vld [vmem:[#allocation2] sm:$0xff]  ;;  %386 = vmatpush.msra.mxu2 %v357_v24  ;;  %v355_v30 = vld [vmem:[#allocation2 + $0xa] sm:$0xff]  ;;  %p739_p2 = pneg %p738_p1 }
  0x26   : > { %v354_v29 = vld [vmem:[#allocation2 + $0x2] sm:$0xff]  ;;  %317 = vmatpush.msra.mxu0 %v288_v25  ;;  %447 = vmatpush.msra.mxu3 %v441_v35  ;;  %v444_v3 = vld [vmem:[%s994_s4] sm:$0x1] }
  0x27   : > { %617 = vmatmul.msk.f32.vlgmr.msra.gmra.mxu2 %vm272_vm1, %v354_v29  ;;  %346 = vmatpush.msra.mxu1 %v277_v26  ;;  %v286_v31 = vld [vmem:[#allocation2 + $0x9] sm:$0xff]  ;;  %v428_v0 = vld [vmem:[%s993_s3] sm:$0xff]  ;;  %p744_p8 = pnand %p743_p7, %p739_p2 }
  0x28   : > { %613 = vmatmul.msk.f32.vlgmr.msra.gmra.mxu0 %vm272_vm1, %v285_v27  ;;  %615 = vmatmul.msk.f32.vlgmr.msra.gmra.mxu1 %vm272_vm1, %v275_v28  ;;  %v276_v32 = vld [vmem:[#allocation2 + $0x8] sm:$0xff]  ;;  %v484_v2 = vld [vmem:[%s995_s5] sm:$0xff] }
  0x29   : > { %448 = vmatpush.msra.mxu3 %v440_v36  ;;  %v429_v60 = vld [vmem:[%s993_s3 + $0x8] sm:$0xff]  ;;  %504 = vmatpush.msrb.mxu0 %v484_v2 }
  0x2b   : > { %449 = vmatpush.msra.mxu3 %v439_v37 }
  0x2d   : > { %450 = vmatpush.msra.mxu3 %v438_v38 }
  0x2f   : > { %618 = vmatmul.msk.f32.gmra.mxu2 %vm272_vm1, %v355_v30  ;;  %451 = vmatpush.msra.mxu3 %v437_v41 }
  0x30   : > { %614 = vmatmul.msk.f32.gmra.mxu0 %vm272_vm1, %v286_v31  ;;  %616 = vmatmul.msk.f32.gmra.mxu1 %vm272_vm1, %v276_v32 }
  0x31   : > { %452 = vmatpush.msra.mxu3 %v436_v42 }
  0x33   : > { %453 = vmatpush.msra.mxu3 %v435_v44 }
  0x35   : > { %454 = vmatpush.msra.mxu3 %v434_v45 }
  0x37   : > { %455 = vmatpush.msra.mxu3 %v433_v49 }
  0x39   : > { %456 = vmatpush.msra.mxu3 %v432_v51 }
  0x3b   : > { %457 = vmatpush.msra.mxu3 %v431_v55 }
  0x3d   : > { %458 = vmatpush.msra.mxu3 %v430_v57 }
  0x3f   : > { %459 = vmatpush.msra.mxu3 %v429_v60 }
  0x41   : > { %460 = vmatpush.msra.mxu3 %v428_v0 }
  0xa5   : > { %v319_v39 = vpop.f32.mrf.mxu0  ;;  %v348_v40 = vpop.f32.mrf.mxu1 }
  0xa6   : > { %v349_v46 = vadd.f32 %v348_v40, %v319_v39 }
  0xaa   : > { %v388_v43 = vpop.f32.mrf.mxu2 }
  0xab   : > { %v394_v52 = vadd.f32 %v388_v43, %v349_v46 }
  0xad   : > { %v322_v47 = vpop.f32.mrf.mxu0  ;;  %v351_v48 = vpop.f32.mrf.mxu1  ;;  %v400_v59 = vadd.f32 %v685_v53, %v394_v52 }
  0xae   : > { %v352_v50 = vadd.f32 %v351_v48, %v322_v47 }
  0xaf   : > { %v402_v62 = vmax.f32 %v400_v59, 0.0 }
  0xb2   : > { %v391_v54 = vpop.f32.mrf.mxu2 }
  0xb3   : > { %v395_v56 = vadd.f32 %v391_v54, %v352_v50 }
  0xb5   : > { %v401_v58 = vadd.f32 %v685_v53, %v395_v56 }
  0xb7   : > { %v403_v61 = vmax.f32 %v401_v58, 0.0 }
  0xb9   : > { %422 = vmatpush.msrb.mxu1 %v403_v61 }
  0xbb   : > { %423 = vmatpush.msrb.mxu1 %v402_v62 }
  0xbc   : > { %619 = vmatmul.msk.f32.vlgmr.msrb.gmra.mxu1 %vm404_vm2, %v792_v63 }
 0x139   : > { %v425_v1 = vpop.f32.mrf.mxu1 }
 0x13a   : > { %461 = vmatmul.f32.vlgmr.msra.gmra.mxu3 %v425_v1 }
 0x1bd   : > { %v462_v4 = vpop.f32.mrf.mxu3 }
 0x1be   : > { %v463_v5 = vadd.f32 %v462_v4, %v444_v3 }
 0x1c0   : > { %v620_v6 = vmul.f32 -1.442695, %v463_v5 }
 0x1c2   : > { %686 = vpow2.f32 %v620_v6 }
 0x1c8   : > { %v687_v7 = vpop.eup %686 }
 0x1c9   : > { %v468_v8 = vadd.f32 1.0, %v687_v7 }
 0x1cb   : > { %688 = vrcp.f32 %v468_v8  ;;  %v480_v12 = vand.u32 2147483648, %v468_v8  ;;  %v478_v14 = vand.u32 2147483647, %v468_v8  ;;  %vm474_vm4 = vweird.f32 %v468_v8 }
 0x1cd   : > { %v481_v16 = vor.u32 1.1754944e-38, %v480_v12  ;;  %vm479_vm7 = vcmp.eq.f32.partialorder %v478_v14, 8.507059e+37 }
 0x1d1   : > { %v689_v9 = vpop.eup %688 }
 0x1d2   : > { %v470_v10 = vmul.f32 %v689_v9, %v468_v8  ;;  %vm475_vm3 = vweird.f32 %v689_v9 }
 0x1d3   : > { %vm476_vm5 = vmor %vm474_vm4, %vm475_vm3 }
 0x1d4   : > { %v471_v11 = vsub.f32 1.0, %v470_v10 }
 0x1d6   : > { %v472_v13 = vmul.f32 %v689_v9, %v471_v11 }
 0x1d8   : > { %v473_v15 = vadd.f32 %v689_v9, %v472_v13 }
 0x1da   : > { %v477_v17 = vsel %vm476_vm5, %v689_v9, %v473_v15 }
 0x1db   : > { %v482_v18 = vsel %vm479_vm7, %v481_v16, %v477_v17 }
 0x1dc   : > { %621 = vmatmul.msk.f32.vlgmr.msrb.gmra.mxu0 %vm485_vm6, %v482_v18 }
 0x259   : > { %v506_v19 = vpop.f32.mrf.mxu0 }
 0x25a   : > { %v509_v20 = vperm.slane %v506_v19, 0 }
 0x25c   : > { %v510_v21 = vmul.f32 %v509_v20, %v402_v62  ;;  %v511_v22 = vmul.f32 %v509_v20, %v403_v61 }
 0x25e   : > { %512 = vst [vmem:[%s261_s20] sm:$0xff] %v510_v21 }
 0x25f   : > { %513 = vst [vmem:[%s261_s20 + $0x8] sm:$0xff] %v511_v22 }
 0x260   : > { %747 = shalt.err (!%p744_p8)
}
 0x261   : > { %s793_s14 = smov 128   ;;  %s794_s16 = smov 8  }
 0x262   : > { %633 = dma.vmem_to_hbm [thread:$0]  (%p868_p5), %s528_s26, 256, %s530_s28, %s515_s29, %s793_s14, %s793_s14, %s794_s16  }
 0x263 PF: > { %p645_p9 = scmp.ge.s32.totalorder %s786_s24, 2  ;;  %s544_s17 = sand.u32 1, %s774_s21  }
 0x264   : > { %s545_s18 = scalar_lea.sflag [#allocation5], %s544_s17 }
 0x265   : > { %p640_p10 = pnand %p645_p9, %p872_p6 }
 0x267   : > { %p641_p11 = pneg %p640_p10 }
 0x269   : > { %769 = dma.done.wait (%p641_p11), %s545_s18, 256  }
 0x26a   : > { %771 = vsyncadd (%p641_p11), %s545_s18, 4294967040  ;;  %p17_p12 = scmp.ge.s32.totalorder %s855_s27, 4   ;;  %s999_s21 = smov %s778_s22 }
 0x26b   : > { %s1000_s22 = smov %s782_s23  ;;  %s1001_s23 = smov %s866_s30 }
 0x26c   : > { %s1002_s24 = smov %s855_s27  ;;  %19 = sbr.rel (!%p17_p12) target bundleno = 4 (0x4), region = 86 }
 0x271   :  { %551 = vsyncpa [#allocation4], 1 }
 0x272   :  { %553 = vsyncpa [#allocation4 + $0x1], 1 }
 0x273   :  { %554 = vsyncpa [#allocation5], 1 }
 0x274   :  { %556 = vsyncpa [#allocation5 + $0x1], 1 }

</bundles_post_ra>
